<compile_context>
chip_gen: v5e
topology: v5e:2x2
jax: 0.10.0
libtpu: 0.0.40
codegen_flags: <defaults>
</compile_context>

<pallas_src>
import jax
import jax.numpy as jnp
from jax.experimental import pallas as pl
from jax.experimental.pallas import tpu as pltpu


MAX_LEN = 64      # fixed by AbsolutePositionalEncoder (chess board: 64 squares)
D_MODEL = 512     # module-level constant in the reference


def make_sinusoidal_table(seq_len: int, d_model: int, dtype=jnp.float32):
    """Replicates AbsolutePositionalEncoder.__init__ (interleaved sin/cos)."""
    position = jnp.arange(seq_len, dtype=jnp.float32)[:, None]          # (S, 1)
    two_i = jnp.arange(0, d_model, 2, dtype=jnp.float32)                # (D/2,)
    angle = position / jnp.power(10000.0, two_i / float(d_model))       # (S, D/2)
    pe = jnp.zeros((seq_len, d_model), dtype=jnp.float32)
    pe = pe.at[:, 0::2].set(jnp.sin(angle))
    pe = pe.at[:, 1::2].set(jnp.cos(angle))
    return pe.astype(dtype)


def _pos_broadcast_kernel(pe_ref, o_ref):
    # pe_ref: (seq_len, d_model)          -- same block every grid step
    # o_ref:  (B_TILE, seq_len, d_model)  -- one batch tile of the output
    o_ref[...] = jnp.broadcast_to(pe_ref[...], o_ref.shape)


def _num_tensorcores() -> int:
    """Best-effort TensorCore count of device 0 (1 on failure = safe default)."""
    try:
        info = pltpu.get_tpu_info()
        for attr in ("num_cores", "core_count", "tensorcore_count", "num_tensorcores"):
            n = getattr(info, attr, None)
            if isinstance(n, int) and n >= 1:
                return n
    except Exception:
        pass
    try:
        n = getattr(jax.devices()[0], "num_cores", 1)
        return max(1, int(n))
    except Exception:
        return 1


def _pick_batch_tile(batch, row_block_bytes, target_block_bytes, num_cores):
    """Largest batch tile whose output block fits the byte budget.

    On multi-TensorCore parts (v7x) keep >= num_cores grid steps so
    dimension_semantics=("parallel",) can shard the grid across cores.
    On single-TC parts (v5e/v6e) let small batches run as one big block.
    """
    cap = max(1, target_block_bytes // row_block_bytes)
    if num_cores > 1 and batch >= num_cores:
        cap = min(cap, max(1, batch // num_cores))
    return max(1, min(cap, batch))


def absolute_positional_encoder(x, pe_table, *, target_block_bytes=8 << 20):
    """Equivalent of AbsolutePositionalEncoder.forward.

    Args:
      x: [batch, ...] -- only x.shape[0] (batch size) is used, as in torch.
      pe_table: [64, d_model] fixed sinusoidal encoding.
    Returns:
      [batch, 64, d_model] table broadcast over batch (dtype of pe_table).
    """
    batch = x.shape[0]
    seq_len, d_model = pe_table.shape
    itemsize = jnp.dtype(pe_table.dtype).itemsize
    row_block_bytes = seq_len * d_model * itemsize            # one batch row

    b_tile = _pick_batch_tile(batch, row_block_bytes, target_block_bytes,
                              _num_tensorcores())
    grid = (pl.cdiv(batch, b_tile),)                          # ragged last block OK

    out_bytes = batch * row_block_bytes
    cost = pl.CostEstimate(flops=0, transcendentals=0,
                           bytes_accessed=out_bytes + row_block_bytes)

    # Double-buffered output tiles + (double-buffered) table + headroom.
    # Never lower below the 32 MiB default; stay well inside v7x's 64 MiB VMEM.
    needed = 2 * b_tile * row_block_bytes + 2 * row_block_bytes + (1 << 20)
    vmem_limit = min(max(needed, 32 << 20), 48 << 20)

    return pl.pallas_call(
        _pos_broadcast_kernel,
        out_shape=jax.ShapeDtypeStruct((batch, seq_len, d_model), pe_table.dtype),
        grid=grid,
        in_specs=[pl.BlockSpec((seq_len, d_model), lambda b: (0, 0))],
        out_specs=pl.BlockSpec((b_tile, seq_len, d_model), lambda b: (b, 0, 0)),
        compiler_params=pltpu.CompilerParams(
            dimension_semantics=("parallel",),
            vmem_limit_bytes=vmem_limit),
        cost_estimate=cost,
    )(pe_table)


if __name__ == "__main__":
    # Shapes consistent with BT4: the positional encoder always produces
    # (batch, 64, d_model) with d_model=512; keep batch small for the test.
    batch = 4

    key = jax.random.PRNGKey(0)
    # x is the post-embedding activation (b*seq, 64, d_model); only its batch
    # dim matters to the positional encoder, exactly as in the torch module.
    x = jax.random.normal(key, (batch, MAX_LEN, D_MODEL), dtype=jnp.float32)

    pe_table = make_sinusoidal_table(MAX_LEN, D_MODEL, dtype=jnp.float32)

    out = absolute_positional_encoder(x, pe_table)
    out = jax.block_until_ready(out)

    # Reference: positional_encoding.expand(batch, -1, -1)
    ref = jnp.broadcast_to(pe_table[None, :, :], (batch, MAX_LEN, D_MODEL))
    assert out.shape == (batch, MAX_LEN, D_MODEL)
    assert out.dtype == pe_table.dtype
    assert jnp.allclose(out, ref), "mismatch vs reference"

    print("KERNEL_OK")
</pallas_src>

<mosaic_0001>
module attributes {stable_mosaic.version = 11 : i64} {
  func.func @_pos_broadcast_kernel(%arg0: i32, %arg1: memref<64x512xf32, #tpu.memory_space<vmem>>, %arg2: memref<4x64x512xf32, #tpu.memory_space<vmem>>) attributes {dimension_semantics = [#tpu.dimension_semantics<parallel>], iteration_bounds = array<i64: 1>, scalar_prefetch = 0 : i64, scratch_operands = 0 : i64, tpu.core_type = #tpu.core_type<tc>, window_params = [{pipeline_mode = #tpu.pipeline_mode<synchronous>, transform_indices = @transform_0, window_bounds = array<i64: 64, 512>}, {transform_indices = @transform_1, window_bounds = array<i64: 4, 64, 512>}]} {
    %c0 = arith.constant 0 : index
    %c0_0 = arith.constant 0 : index
    %0 = vector.load %arg1[%c0, %c0_0] : memref<64x512xf32, #tpu.memory_space<vmem>>, vector<64x512xf32>
    %1 = vector.shape_cast %0 : vector<64x512xf32> to vector<1x64x512xf32>
    %2 = vector.broadcast %1 : vector<1x64x512xf32> to vector<4x64x512xf32>
    %c0_1 = arith.constant 0 : index
    %c0_2 = arith.constant 0 : index
    %c0_3 = arith.constant 0 : index
    %3 = vector.load %arg2[%c0_1, %c0_2, %c0_3] : memref<4x64x512xf32, #tpu.memory_space<vmem>>, vector<4x64x512xf32>
    tpu.vector_store %arg2[%c0_1, %c0_2, %c0_3], %2 {strides = array<i32>} : memref<4x64x512xf32, #tpu.memory_space<vmem>>, vector<4x64x512xf32>,
    return
  }
  func.func @transform_0(%arg0: i32) -> (i32, i32) {
    %c0_i32 = arith.constant 0 : i32
    %c0_i32_0 = arith.constant 0 : i32
    %c0_i32_1 = arith.constant 0 : i32
    return %c0_i32, %c0_i32_0 : i32, i32
  }
  func.func @transform_1(%arg0: i32) -> (i32, i32, i32) {
    %c0_i32 = arith.constant 0 : i32
    %c0_i32_0 = arith.constant 0 : i32
    %c0_i32_1 = arith.constant 0 : i32
    return %arg0, %c0_i32, %c0_i32_0 : i32, i32, i32
  }
}

</mosaic_0001>

<bundles_post_ra>
// kernel: tpu_custom_call.1
= control target key start
LH: loop header
LB: loop body
LE: loop exit
PB: predicated region body
PF: predicated region fallthrough
CT: control target
= control target key end

     0   :  { %6 = vsyncpa [#allocation3], 0  ;;  %s286_s0 = inlined_call_operand.hbm [shape: f32[64,512], index: 0, kind: input, shape index: {}]   ;;  %s287_s1 = inlined_call_operand.hbm [shape: f32[4,64,512], index: 1, kind: output, shape index: {}]  }
   0x1   :  { %7 = vsyncpa [#allocation4], 0  ;;  %s12_s8 = sshll.u32 %s286_s0, 4  ;;  %s260_s9 = smov [#allocation2]   ;;  %s13_s8 = int_to_ptr.hbm [resolvable:$true] %s12_s8 }
   0x2   :  { %s14_s10 = sshll.u32 %s260_s9, 4  ;;  %s261_s11 = smov 512   ;;  %s15_s10 = int_to_ptr.vmem [resolvable:$true] %s14_s10 }
   0x3   :  { %s262_s12 = smov 32  }
   0x4   :  { %20 = dma.hbm_to_vmem [thread:$0]  %s13_s8, 4096, %s15_s10, [#allocation3], %s261_s11, %s261_s11, %s262_s12  }
   0x5   :  { %256 = dma.done.wait [#allocation3], 4096  }
   0x6   :  { %257 = vsyncadd [#allocation3], 4294963200  ;;  %v25_v0 = vld [vmem:[#allocation2] sm:$0xff]  ;;  %v26_v1 = vld [vmem:[#allocation2 + $0x8] sm:$0xff]  ;;  %s263_s0 = smov [#allocation5]   ;;  %s191_s16 = sshll.u32 %s287_s1, 4  ;;  %s192_s16 = int_to_ptr.hbm [resolvable:$true] %s191_s16 }
   0x7   :  { %57 = vst [vmem:[#allocation5] sm:$0xff] %v25_v0  ;;  %v27_v2 = vld [vmem:[#allocation2 + $0x10] sm:$0xff]  ;;  %v28_v3 = vld [vmem:[#allocation2 + $0x18] sm:$0xff]  ;;  %v29_v4 = vld [vmem:[#allocation2 + $0x20] sm:$0xff]  ;;  %s189_s13 = sshll.u32 %s263_s0, 4  ;;  %s190_s13 = int_to_ptr.vmem [resolvable:$true] %s189_s13 }
   0x8   :  { %89 = vst [vmem:[#allocation5 + $0x100] sm:$0xff] %v25_v0  ;;  %v30_v5 = vld [vmem:[#allocation2 + $0x28] sm:$0xff]  ;;  %v31_v6 = vld [vmem:[#allocation2 + $0x30] sm:$0xff]  ;;  %v32_v7 = vld [vmem:[#allocation2 + $0x38] sm:$0xff] }
   0x9   :  { %121 = vst [vmem:[#allocation5 + $0x200] sm:$0xff] %v25_v0  ;;  %v33_v8 = vld [vmem:[#allocation2 + $0x40] sm:$0xff]  ;;  %v34_v9 = vld [vmem:[#allocation2 + $0x48] sm:$0xff]  ;;  %v35_v10 = vld [vmem:[#allocation2 + $0x50] sm:$0xff] }
   0xa   :  { %153 = vst [vmem:[#allocation5 + $0x300] sm:$0xff] %v25_v0  ;;  %v36_v11 = vld [vmem:[#allocation2 + $0x58] sm:$0xff]  ;;  %v37_v12 = vld [vmem:[#allocation2 + $0x60] sm:$0xff]  ;;  %v38_v13 = vld [vmem:[#allocation2 + $0x68] sm:$0xff] }
   0xb   :  { %58 = vst [vmem:[#allocation5 + $0x8] sm:$0xff] %v26_v1  ;;  %v39_v14 = vld [vmem:[#allocation2 + $0x70] sm:$0xff]  ;;  %v40_v15 = vld [vmem:[#allocation2 + $0x78] sm:$0xff]  ;;  %v41_v16 = vld [vmem:[#allocation2 + $0x80] sm:$0xff] }
   0xc   :  { %90 = vst [vmem:[#allocation5 + $0x108] sm:$0xff] %v26_v1  ;;  %v42_v17 = vld [vmem:[#allocation2 + $0x88] sm:$0xff]  ;;  %v43_v18 = vld [vmem:[#allocation2 + $0x90] sm:$0xff]  ;;  %v44_v19 = vld [vmem:[#allocation2 + $0x98] sm:$0xff] }
   0xd   :  { %122 = vst [vmem:[#allocation5 + $0x208] sm:$0xff] %v26_v1  ;;  %v45_v20 = vld [vmem:[#allocation2 + $0xa0] sm:$0xff]  ;;  %v46_v21 = vld [vmem:[#allocation2 + $0xa8] sm:$0xff]  ;;  %v47_v22 = vld [vmem:[#allocation2 + $0xb0] sm:$0xff] }
   0xe   :  { %154 = vst [vmem:[#allocation5 + $0x308] sm:$0xff] %v26_v1  ;;  %v48_v23 = vld [vmem:[#allocation2 + $0xb8] sm:$0xff]  ;;  %v49_v24 = vld [vmem:[#allocation2 + $0xc0] sm:$0xff]  ;;  %v50_v25 = vld [vmem:[#allocation2 + $0xc8] sm:$0xff] }
   0xf   :  { %59 = vst [vmem:[#allocation5 + $0x10] sm:$0xff] %v27_v2  ;;  %v51_v26 = vld [vmem:[#allocation2 + $0xd0] sm:$0xff]  ;;  %v52_v27 = vld [vmem:[#allocation2 + $0xd8] sm:$0xff]  ;;  %v53_v28 = vld [vmem:[#allocation2 + $0xe0] sm:$0xff] }
  0x10   :  { %91 = vst [vmem:[#allocation5 + $0x110] sm:$0xff] %v27_v2  ;;  %v54_v29 = vld [vmem:[#allocation2 + $0xe8] sm:$0xff]  ;;  %v55_v30 = vld [vmem:[#allocation2 + $0xf0] sm:$0xff]  ;;  %v56_v31 = vld [vmem:[#allocation2 + $0xf8] sm:$0xff] }
  0x11   :  { %123 = vst [vmem:[#allocation5 + $0x210] sm:$0xff] %v27_v2 }
  0x12   :  { %155 = vst [vmem:[#allocation5 + $0x310] sm:$0xff] %v27_v2 }
  0x13   :  { %60 = vst [vmem:[#allocation5 + $0x18] sm:$0xff] %v28_v3 }
  0x14   :  { %92 = vst [vmem:[#allocation5 + $0x118] sm:$0xff] %v28_v3 }
  0x15   :  { %124 = vst [vmem:[#allocation5 + $0x218] sm:$0xff] %v28_v3 }
  0x16   :  { %156 = vst [vmem:[#allocation5 + $0x318] sm:$0xff] %v28_v3 }
  0x17   :  { %61 = vst [vmem:[#allocation5 + $0x20] sm:$0xff] %v29_v4 }
  0x18   :  { %93 = vst [vmem:[#allocation5 + $0x120] sm:$0xff] %v29_v4 }
  0x19   :  { %125 = vst [vmem:[#allocation5 + $0x220] sm:$0xff] %v29_v4 }
  0x1a   :  { %157 = vst [vmem:[#allocation5 + $0x320] sm:$0xff] %v29_v4 }
  0x1b   :  { %62 = vst [vmem:[#allocation5 + $0x28] sm:$0xff] %v30_v5 }
  0x1c   :  { %94 = vst [vmem:[#allocation5 + $0x128] sm:$0xff] %v30_v5 }
  0x1d   :  { %126 = vst [vmem:[#allocation5 + $0x228] sm:$0xff] %v30_v5 }
  0x1e   :  { %158 = vst [vmem:[#allocation5 + $0x328] sm:$0xff] %v30_v5 }
  0x1f   :  { %63 = vst [vmem:[#allocation5 + $0x30] sm:$0xff] %v31_v6 }
  0x20   :  { %95 = vst [vmem:[#allocation5 + $0x130] sm:$0xff] %v31_v6 }
  0x21   :  { %127 = vst [vmem:[#allocation5 + $0x230] sm:$0xff] %v31_v6 }
  0x22   :  { %159 = vst [vmem:[#allocation5 + $0x330] sm:$0xff] %v31_v6 }
  0x23   :  { %64 = vst [vmem:[#allocation5 + $0x38] sm:$0xff] %v32_v7 }
  0x24   :  { %96 = vst [vmem:[#allocation5 + $0x138] sm:$0xff] %v32_v7 }
  0x25   :  { %128 = vst [vmem:[#allocation5 + $0x238] sm:$0xff] %v32_v7 }
  0x26   :  { %160 = vst [vmem:[#allocation5 + $0x338] sm:$0xff] %v32_v7 }
  0x27   :  { %65 = vst [vmem:[#allocation5 + $0x40] sm:$0xff] %v33_v8 }
  0x28   :  { %97 = vst [vmem:[#allocation5 + $0x140] sm:$0xff] %v33_v8 }
  0x29   :  { %129 = vst [vmem:[#allocation5 + $0x240] sm:$0xff] %v33_v8 }
  0x2a   :  { %161 = vst [vmem:[#allocation5 + $0x340] sm:$0xff] %v33_v8 }
  0x2b   :  { %66 = vst [vmem:[#allocation5 + $0x48] sm:$0xff] %v34_v9 }
  0x2c   :  { %98 = vst [vmem:[#allocation5 + $0x148] sm:$0xff] %v34_v9 }
  0x2d   :  { %130 = vst [vmem:[#allocation5 + $0x248] sm:$0xff] %v34_v9 }
  0x2e   :  { %162 = vst [vmem:[#allocation5 + $0x348] sm:$0xff] %v34_v9 }
  0x2f   :  { %67 = vst [vmem:[#allocation5 + $0x50] sm:$0xff] %v35_v10 }
  0x30   :  { %99 = vst [vmem:[#allocation5 + $0x150] sm:$0xff] %v35_v10 }
  0x31   :  { %131 = vst [vmem:[#allocation5 + $0x250] sm:$0xff] %v35_v10 }
  0x32   :  { %163 = vst [vmem:[#allocation5 + $0x350] sm:$0xff] %v35_v10 }
  0x33   :  { %68 = vst [vmem:[#allocation5 + $0x58] sm:$0xff] %v36_v11 }
  0x34   :  { %100 = vst [vmem:[#allocation5 + $0x158] sm:$0xff] %v36_v11 }
  0x35   :  { %132 = vst [vmem:[#allocation5 + $0x258] sm:$0xff] %v36_v11 }
  0x36   :  { %164 = vst [vmem:[#allocation5 + $0x358] sm:$0xff] %v36_v11 }
  0x37   :  { %69 = vst [vmem:[#allocation5 + $0x60] sm:$0xff] %v37_v12 }
  0x38   :  { %101 = vst [vmem:[#allocation5 + $0x160] sm:$0xff] %v37_v12 }
  0x39   :  { %133 = vst [vmem:[#allocation5 + $0x260] sm:$0xff] %v37_v12 }
  0x3a   :  { %165 = vst [vmem:[#allocation5 + $0x360] sm:$0xff] %v37_v12 }
  0x3b   :  { %70 = vst [vmem:[#allocation5 + $0x68] sm:$0xff] %v38_v13 }
  0x3c   :  { %102 = vst [vmem:[#allocation5 + $0x168] sm:$0xff] %v38_v13 }
  0x3d   :  { %134 = vst [vmem:[#allocation5 + $0x268] sm:$0xff] %v38_v13 }
  0x3e   :  { %166 = vst [vmem:[#allocation5 + $0x368] sm:$0xff] %v38_v13 }
  0x3f   :  { %71 = vst [vmem:[#allocation5 + $0x70] sm:$0xff] %v39_v14 }
  0x40   :  { %103 = vst [vmem:[#allocation5 + $0x170] sm:$0xff] %v39_v14 }
  0x41   :  { %135 = vst [vmem:[#allocation5 + $0x270] sm:$0xff] %v39_v14 }
  0x42   :  { %167 = vst [vmem:[#allocation5 + $0x370] sm:$0xff] %v39_v14 }
  0x43   :  { %72 = vst [vmem:[#allocation5 + $0x78] sm:$0xff] %v40_v15 }
  0x44   :  { %104 = vst [vmem:[#allocation5 + $0x178] sm:$0xff] %v40_v15 }
  0x45   :  { %136 = vst [vmem:[#allocation5 + $0x278] sm:$0xff] %v40_v15 }
  0x46   :  { %168 = vst [vmem:[#allocation5 + $0x378] sm:$0xff] %v40_v15 }
  0x47   :  { %73 = vst [vmem:[#allocation5 + $0x80] sm:$0xff] %v41_v16 }
  0x48   :  { %105 = vst [vmem:[#allocation5 + $0x180] sm:$0xff] %v41_v16 }
  0x49   :  { %137 = vst [vmem:[#allocation5 + $0x280] sm:$0xff] %v41_v16 }
  0x4a   :  { %169 = vst [vmem:[#allocation5 + $0x380] sm:$0xff] %v41_v16 }
  0x4b   :  { %74 = vst [vmem:[#allocation5 + $0x88] sm:$0xff] %v42_v17 }
  0x4c   :  { %106 = vst [vmem:[#allocation5 + $0x188] sm:$0xff] %v42_v17 }
  0x4d   :  { %138 = vst [vmem:[#allocation5 + $0x288] sm:$0xff] %v42_v17 }
  0x4e   :  { %170 = vst [vmem:[#allocation5 + $0x388] sm:$0xff] %v42_v17 }
  0x4f   :  { %75 = vst [vmem:[#allocation5 + $0x90] sm:$0xff] %v43_v18 }
  0x50   :  { %107 = vst [vmem:[#allocation5 + $0x190] sm:$0xff] %v43_v18 }
  0x51   :  { %139 = vst [vmem:[#allocation5 + $0x290] sm:$0xff] %v43_v18 }
  0x52   :  { %171 = vst [vmem:[#allocation5 + $0x390] sm:$0xff] %v43_v18 }
  0x53   :  { %76 = vst [vmem:[#allocation5 + $0x98] sm:$0xff] %v44_v19 }
  0x54   :  { %108 = vst [vmem:[#allocation5 + $0x198] sm:$0xff] %v44_v19 }
  0x55   :  { %140 = vst [vmem:[#allocation5 + $0x298] sm:$0xff] %v44_v19 }
  0x56   :  { %172 = vst [vmem:[#allocation5 + $0x398] sm:$0xff] %v44_v19 }
  0x57   :  { %77 = vst [vmem:[#allocation5 + $0xa0] sm:$0xff] %v45_v20 }
  0x58   :  { %109 = vst [vmem:[#allocation5 + $0x1a0] sm:$0xff] %v45_v20 }
  0x59   :  { %141 = vst [vmem:[#allocation5 + $0x2a0] sm:$0xff] %v45_v20 }
  0x5a   :  { %173 = vst [vmem:[#allocation5 + $0x3a0] sm:$0xff] %v45_v20 }
  0x5b   :  { %78 = vst [vmem:[#allocation5 + $0xa8] sm:$0xff] %v46_v21 }
  0x5c   :  { %110 = vst [vmem:[#allocation5 + $0x1a8] sm:$0xff] %v46_v21 }
  0x5d   :  { %142 = vst [vmem:[#allocation5 + $0x2a8] sm:$0xff] %v46_v21 }
  0x5e   :  { %174 = vst [vmem:[#allocation5 + $0x3a8] sm:$0xff] %v46_v21 }
  0x5f   :  { %79 = vst [vmem:[#allocation5 + $0xb0] sm:$0xff] %v47_v22 }
  0x60   :  { %111 = vst [vmem:[#allocation5 + $0x1b0] sm:$0xff] %v47_v22 }
  0x61   :  { %143 = vst [vmem:[#allocation5 + $0x2b0] sm:$0xff] %v47_v22 }
  0x62   :  { %175 = vst [vmem:[#allocation5 + $0x3b0] sm:$0xff] %v47_v22 }
  0x63   :  { %80 = vst [vmem:[#allocation5 + $0xb8] sm:$0xff] %v48_v23 }
  0x64   :  { %112 = vst [vmem:[#allocation5 + $0x1b8] sm:$0xff] %v48_v23 }
  0x65   :  { %144 = vst [vmem:[#allocation5 + $0x2b8] sm:$0xff] %v48_v23 }
  0x66   :  { %176 = vst [vmem:[#allocation5 + $0x3b8] sm:$0xff] %v48_v23 }
  0x67   :  { %81 = vst [vmem:[#allocation5 + $0xc0] sm:$0xff] %v49_v24 }
  0x68   :  { %113 = vst [vmem:[#allocation5 + $0x1c0] sm:$0xff] %v49_v24 }
  0x69   :  { %145 = vst [vmem:[#allocation5 + $0x2c0] sm:$0xff] %v49_v24 }
  0x6a   :  { %177 = vst [vmem:[#allocation5 + $0x3c0] sm:$0xff] %v49_v24 }
  0x6b   :  { %82 = vst [vmem:[#allocation5 + $0xc8] sm:$0xff] %v50_v25 }
  0x6c   :  { %114 = vst [vmem:[#allocation5 + $0x1c8] sm:$0xff] %v50_v25 }
  0x6d   :  { %146 = vst [vmem:[#allocation5 + $0x2c8] sm:$0xff] %v50_v25 }
  0x6e   :  { %178 = vst [vmem:[#allocation5 + $0x3c8] sm:$0xff] %v50_v25 }
  0x6f   :  { %83 = vst [vmem:[#allocation5 + $0xd0] sm:$0xff] %v51_v26 }
  0x70   :  { %115 = vst [vmem:[#allocation5 + $0x1d0] sm:$0xff] %v51_v26 }
  0x71   :  { %147 = vst [vmem:[#allocation5 + $0x2d0] sm:$0xff] %v51_v26 }
  0x72   :  { %179 = vst [vmem:[#allocation5 + $0x3d0] sm:$0xff] %v51_v26 }
  0x73   :  { %84 = vst [vmem:[#allocation5 + $0xd8] sm:$0xff] %v52_v27 }
  0x74   :  { %116 = vst [vmem:[#allocation5 + $0x1d8] sm:$0xff] %v52_v27 }
  0x75   :  { %148 = vst [vmem:[#allocation5 + $0x2d8] sm:$0xff] %v52_v27 }
  0x76   :  { %180 = vst [vmem:[#allocation5 + $0x3d8] sm:$0xff] %v52_v27 }
  0x77   :  { %85 = vst [vmem:[#allocation5 + $0xe0] sm:$0xff] %v53_v28 }
  0x78   :  { %117 = vst [vmem:[#allocation5 + $0x1e0] sm:$0xff] %v53_v28 }
  0x79   :  { %149 = vst [vmem:[#allocation5 + $0x2e0] sm:$0xff] %v53_v28 }
  0x7a   :  { %181 = vst [vmem:[#allocation5 + $0x3e0] sm:$0xff] %v53_v28 }
  0x7b   :  { %86 = vst [vmem:[#allocation5 + $0xe8] sm:$0xff] %v54_v29 }
  0x7c   :  { %118 = vst [vmem:[#allocation5 + $0x1e8] sm:$0xff] %v54_v29 }
  0x7d   :  { %150 = vst [vmem:[#allocation5 + $0x2e8] sm:$0xff] %v54_v29 }
  0x7e   :  { %182 = vst [vmem:[#allocation5 + $0x3e8] sm:$0xff] %v54_v29 }
  0x7f   :  { %87 = vst [vmem:[#allocation5 + $0xf0] sm:$0xff] %v55_v30 }
  0x80   :  { %119 = vst [vmem:[#allocation5 + $0x1f0] sm:$0xff] %v55_v30 }
  0x81   :  { %151 = vst [vmem:[#allocation5 + $0x2f0] sm:$0xff] %v55_v30 }
  0x82   :  { %183 = vst [vmem:[#allocation5 + $0x3f0] sm:$0xff] %v55_v30 }
  0x83   :  { %88 = vst [vmem:[#allocation5 + $0xf8] sm:$0xff] %v56_v31 }
  0x84   :  { %120 = vst [vmem:[#allocation5 + $0x1f8] sm:$0xff] %v56_v31 }
  0x85   :  { %152 = vst [vmem:[#allocation5 + $0x2f8] sm:$0xff] %v56_v31 }
  0x86   :  { %184 = vst [vmem:[#allocation5 + $0x3f8] sm:$0xff] %v56_v31 }
  0x87   :  { %197 = dma.vmem_to_hbm [thread:$0]  %s190_s13, 16384, %s192_s16, [#allocation4], %s261_s11, %s261_s11, %s262_s12  }
  0x88   :  { %258 = dma.done.wait [#allocation4], 16384  }
  0x89   :  { %259 = vsyncadd [#allocation4], 4294950912 }
  0x8a   :  { %202 = vsyncpa [#allocation3], 1 }
  0x8b   :  { %203 = vsyncpa [#allocation4], 1 }

</bundles_post_ra>
